<compile_context>
chip_gen: v7x
topology: tpu7x:2x2x1
jax: 0.10.0
libtpu: 0.0.40
codegen_flags: <defaults>
</compile_context>

<pallas_src>
import math
import functools

import jax
import jax.numpy as jnp
from jax.experimental import pallas as pl
from jax.experimental.pallas import tpu as pltpu

_LANE = 128  # TPU lane width; also the halo-chunk width


def _gelu_exact(x):
    # nn.GELU() default (approximate='none'): 0.5*x*(1+erf(x/sqrt(2)))
    return 0.5 * x * (1.0 + jax.lax.erf(x * 0.7071067811865476))


def output_size(input_size, kernel_size, stride, padding, dilation=1):
    if padding == "same":
        return input_size
    raw = math.floor(
        (input_size + 2 * padding - dilation * (kernel_size - 1) - 1) / stride + 1
    )
    return int(raw)


def _round_up(x, m):
    return ((x + m - 1) // m) * m


def _vmem_budget():
    """Generation-aware VMEM sizing (v5e/v6e: 128 MiB, v7x: 64 MiB per core)."""
    cap = 64 * 1024 * 1024  # conservative fallback (v7x-sized)
    try:
        info = pltpu.get_tpu_info()
        cap = int(getattr(info, "vmem_capacity_bytes", cap)) or cap
    except Exception:
        pass
    limit = min((3 * cap) // 4, 96 * 1024 * 1024)  # ~96 MiB on 128 MiB parts, 48 MiB on v7x
    return limit, limit // 4                       # (vmem_limit_bytes, per-step budget)


def _choose_time_tile(l_out, cin, cout, k, in_bytes, op_bytes, out_bytes, budget):
    """Largest 128-multiple time tile whose per-step working set fits the budget."""
    def est(tl):
        win = tl + 2 * _LANE
        streamed = 2 * (cin * win * in_bytes + cout * tl * out_bytes)   # double-buffered DMA blocks
        resident = cout * k * cin * op_bytes + cout * 4                 # weights + bias (constant maps)
        temps = (cin * win * (4 + op_bytes)                             # f32 window + GELU'd window
                 + k * cin * tl * op_bytes                              # stacked MXU operand
                 + cout * tl * 4)                                       # f32 accumulator
        return streamed + resident + temps

    tl = _LANE
    for cand in (256, 512, 1024, 2048, 4096, 8192, 16384, 32768):
        if est(cand) <= budget:
            tl = cand
    return tl


def _conv_block1d_kernel(xm_ref, xl_ref, xr_ref, w_ref, b_ref, o_ref, *,
                         kernel_size, dilation, pad_l, seq_len, tl, op_dtype):
    """Fused GELU + Conv1d for one (batch row, time tile) block.

    xm_ref: (Cin, tl)        main time tile of the *unpadded* input (lane = time)
    xl_ref: (Cin, 128)       left halo chunk  (clamped at the sequence start)
    xr_ref: (Cin, 128)       right halo chunk (clamped at the sequence end)
    w_ref : (Cout, K*Cin)    conv weights, tap-major contraction, VMEM-resident
    b_ref : (Cout, 1)        bias (f32)
    o_ref : (Cout, tl)       output tile (lane-dense stores)
    """
    t = pl.program_id(1)
    width = tl + 2 * _LANE

    # window column j corresponds to global input position  t*tl - 128 + j
    win = jnp.concatenate([xl_ref[...], xm_ref[...], xr_ref[...]], axis=-1)

    # In-kernel zero padding / boundary masking: zero every lane whose intended
    # global position lies outside [0, L).  GELU(0) == 0, so masking before the
    # activation reproduces Conv1d's zero padding of the activation output.
    pos = t * tl - _LANE + jax.lax.broadcasted_iota(jnp.int32, (1, width), 1)
    valid = (pos >= 0) & (pos < seq_len)
    win = jnp.where(valid, win, jnp.zeros_like(win))

    # Exact-erf GELU (nn.GELU default) in f32, cast back to the matmul dtype.
    # TODO(synk): optionally use tanh-approx GELU (EUP) when model tolerance allows.
    h = _gelu_exact(win.astype(jnp.float32)).astype(op_dtype)

    # Fuse the K taps into a single dot: stack the lane-shifted slices along
    # sublanes -> (K*Cin, tl), contract against (Cout, K*Cin) in one MXU pass.
    base = _LANE - pad_l
    pieces = [h[:, base + k * dilation: base + k * dilation + tl]
              for k in range(kernel_size)]
    stacked = pieces[0] if kernel_size == 1 else jnp.concatenate(pieces, axis=0)

    acc = jax.lax.dot_general(
        w_ref[...], stacked,
        dimension_numbers=(((1,), (0,)), ((), ())),
        preferred_element_type=jnp.float32,
    )
    o_ref[...] = (acc + b_ref[...]).astype(o_ref.dtype)


def convolution_block1d(x_ncl, weight, bias, *, kernel_size=3, dilation=1,
                        stride=1, padding="same", time_tile=None, mxu_dtype=None):
    """Forward pass of ConvolutionBlock1d (GELU -> Conv1d).

    x_ncl:  (B, Cin, L)    -- PyTorch NCL layout
    weight: (Cout, Cin, K) -- PyTorch Conv1d weight layout
    bias:   (Cout,)
    returns (B, Cout, Lout)
    """
    assert stride == 1, "only stride=1 supported (module default)"
    # TODO(synk): groups > 1 not implemented (module default groups=1).
    # TODO(synk): block several batch rows per grid step when Cin is tiny.

    B, Cin, L = x_ncl.shape
    Cout, Cin_w, K = weight.shape
    assert Cin_w == Cin and K == kernel_size

    halo = dilation * (kernel_size - 1)
    assert 0 <= halo <= _LANE, "dilation*(kernel_size-1) must be <= 128"

    if padding == "same":
        pad_l = halo // 2
        Lout = L
    else:
        pad_l = int(padding)
        Lout = output_size(L, kernel_size, stride, padding, dilation)
    assert 0 <= pad_l <= _LANE and Lout >= 1

    # bf16 inputs keep the MXU in bf16; f32 inputs stay f32 (faithful numerics).
    op_dtype = jnp.bfloat16 if x_ncl.dtype == jnp.bfloat16 else jnp.float32
    if mxu_dtype is not None:
        op_dtype = mxu_dtype

    in_bytes = x_ncl.dtype.itemsize
    out_bytes = x_ncl.dtype.itemsize
    op_bytes = jnp.dtype(op_dtype).itemsize

    vmem_limit, budget = _vmem_budget()
    if time_tile is not None:
        tl = _round_up(max(int(time_tile), 1), _LANE)       # enforce 128-multiple
    else:
        tl = _choose_time_tile(Lout, Cin, Cout, K, in_bytes, op_bytes, out_bytes, budget)
    tl = max(_LANE, min(tl, _round_up(Lout, _LANE)))
    # Keep at least two grid steps when B == 1 so both v7x TensorCores get work.
    if B == 1 and Lout > _LANE:
        tl = min(tl, max(_LANE, _round_up((Lout + 1) // 2, _LANE)))

    n_t = pl.cdiv(Lout, tl)
    hs = tl // _LANE                      # main-tile width in 128-lane chunks
    n_main = pl.cdiv(L, tl)               # valid main-tile block indices
    n_ch = pl.cdiv(L, _LANE)              # valid 128-lane chunk indices

    # Weights: (Cout, Cin, K) -> (Cout, K, Cin) -> (Cout, K*Cin), pre-cast once.
    w2 = jnp.transpose(weight, (0, 2, 1)).reshape(Cout, K * Cin).astype(op_dtype)
    b2 = bias.reshape(Cout, 1).astype(jnp.float32)

    kernel = functools.partial(
        _conv_block1d_kernel, kernel_size=K, dilation=dilation, pad_l=pad_l,
        seq_len=L, tl=tl, op_dtype=op_dtype)

    out = pl.pallas_call(
        kernel,
        out_shape=jax.ShapeDtypeStruct((B, Cout, Lout), x_ncl.dtype),
        grid=(B, n_t),
        in_specs=[
            # main time tile of the (unpadded) input
            pl.BlockSpec((None, Cin, tl),
                         lambda b, t: (b, 0, jnp.minimum(t, n_main - 1))),
            # left halo: last 128-lane chunk of the previous tile (clamped)
            pl.BlockSpec((None, Cin, _LANE),
                         lambda b, t: (b, 0, jnp.clip(t * hs - 1, 0, n_ch - 1))),
            # right halo: first 128-lane chunk of the next tile (clamped)
            pl.BlockSpec((None, Cin, _LANE),
                         lambda b, t: (b, 0, jnp.minimum((t + 1) * hs, n_ch - 1))),
            # weights / bias: constant index maps -> VMEM-resident across the grid
            pl.BlockSpec((Cout, K * Cin), lambda b, t: (0, 0)),
            pl.BlockSpec((Cout, 1), lambda b, t: (0, 0)),
        ],
        out_specs=pl.BlockSpec((None, Cout, tl), lambda b, t: (b, 0, t)),
        compiler_params=pltpu.CompilerParams(
            dimension_semantics=("parallel", "parallel"),
            vmem_limit_bytes=vmem_limit,
        ),
    )(x_ncl, x_ncl, x_ncl, w2, b2)
    return out


def _reference(x_ncl, weight, bias, *, dilation=1):
    """Pure-JAX reference: GELU (exact) then Conv1d 'same'."""
    h = _gelu_exact(x_ncl.astype(jnp.float32))
    out = jax.lax.conv_general_dilated(
        h, weight.astype(jnp.float32),
        window_strides=(1,), padding="SAME",
        rhs_dilation=(dilation,),
        dimension_numbers=("NCH", "OIH", "NCH"),
    )
    return out + bias.reshape(1, -1, 1)


def _run_case(key, B, Cin, Cout, T, K, dilation):
    kx, kw, kb = jax.random.split(key, 3)
    x = jax.random.normal(kx, (B, Cin, T), dtype=jnp.float32)
    fan_in = Cin * K
    bound = 1.0 / math.sqrt(fan_in)
    weight = jax.random.uniform(kw, (Cout, Cin, K), jnp.float32, -bound, bound)
    bias = jax.random.uniform(kb, (Cout,), jnp.float32, -bound, bound)

    out = convolution_block1d(x, weight, bias, kernel_size=K,
                              dilation=dilation, stride=1, padding="same")
    out = jax.block_until_ready(out)
    ref = _reference(x, weight, bias, dilation=dilation)
    assert out.shape == ref.shape, (out.shape, ref.shape)
    err = float(jnp.max(jnp.abs(out - ref)))
    assert jnp.allclose(out, ref, atol=2e-5, rtol=2e-5), err


if __name__ == "__main__":
    key = jax.random.PRNGKey(0)
    k1, k2 = jax.random.split(key)

    # Small shapes consistent with the module's forward: x is (B, Cin, T).
    _run_case(k1, B=2, Cin=4, Cout=8, T=256, K=3, dilation=1)
    # Exercise partial blocks, multi-tile halos and dilation (B=1 -> >=2 steps).
    _run_case(k2, B=1, Cin=3, Cout=5, T=200, K=3, dilation=2)

    print("KERNEL_OK")
</pallas_src>

<mosaic_0001>
module attributes {stable_mosaic.version = 11 : i64} {
  func.func @_conv_block1d_kernel(%arg0: i32, %arg1: i32, %arg2: memref<1x4x256xf32, #tpu.memory_space<vmem>>, %arg3: memref<1x4x128xf32, #tpu.memory_space<vmem>>, %arg4: memref<1x4x128xf32, #tpu.memory_space<vmem>>, %arg5: memref<8x12xf32, #tpu.memory_space<vmem>>, %arg6: memref<8x1xf32, #tpu.memory_space<vmem>>, %arg7: memref<1x8x256xf32, #tpu.memory_space<vmem>>) attributes {dimension_semantics = [#tpu.dimension_semantics<parallel>, #tpu.dimension_semantics<parallel>], iteration_bounds = array<i64: 2, 1>, scalar_prefetch = 0 : i64, scratch_operands = 0 : i64, tpu.core_type = #tpu.core_type<tc>, window_params = [{transform_indices = @transform_0, window_bounds = array<i64: 1, 4, 256>}, {transform_indices = @transform_1, window_bounds = array<i64: 1, 4, 128>}, {transform_indices = @transform_2, window_bounds = array<i64: 1, 4, 128>}, {pipeline_mode = #tpu.pipeline_mode<synchronous>, transform_indices = @transform_3, window_bounds = array<i64: 8, 12>}, {pipeline_mode = #tpu.pipeline_mode<synchronous>, transform_indices = @transform_4, window_bounds = array<i64: 8, 1>}, {transform_indices = @transform_5, window_bounds = array<i64: 1, 8, 256>}]} {
    %c0 = arith.constant 0 : index
    %c0_0 = arith.constant 0 : index
    %c0_1 = arith.constant 0 : index
    %0 = vector.load %arg3[%c0, %c0_0, %c0_1] : memref<1x4x128xf32, #tpu.memory_space<vmem>>, vector<1x4x128xf32>
    %1 = vector.shape_cast %0 : vector<1x4x128xf32> to vector<4x128xf32>
    %c0_2 = arith.constant 0 : index
    %c0_3 = arith.constant 0 : index
    %c0_4 = arith.constant 0 : index
    %2 = vector.load %arg2[%c0_2, %c0_3, %c0_4] : memref<1x4x256xf32, #tpu.memory_space<vmem>>, vector<1x4x256xf32>
    %3 = vector.shape_cast %2 : vector<1x4x256xf32> to vector<4x256xf32>
    %c0_5 = arith.constant 0 : index
    %c0_6 = arith.constant 0 : index
    %c0_7 = arith.constant 0 : index
    %4 = vector.load %arg4[%c0_5, %c0_6, %c0_7] : memref<1x4x128xf32, #tpu.memory_space<vmem>>, vector<1x4x128xf32>
    %5 = vector.shape_cast %4 : vector<1x4x128xf32> to vector<4x128xf32>
    %6 = tpu.concatenate %1, %3, %5 in 1 : vector<4x128xf32>, vector<4x256xf32>, vector<4x128xf32> -> vector<4x512xf32>
    %c256_i32 = arith.constant 256 : i32
    %7 = arith.muli %arg1, %c256_i32 : i32
    %c128_i32 = arith.constant 128 : i32
    %8 = arith.subi %7, %c128_i32 : i32
    %9 = tpu.iota {dimensions = array<i32: 1>} : vector<1x512xi32>
    %10 = vector.broadcast %8 : i32 to vector<1x512xi32>
    %11 = arith.addi %10, %9 : vector<1x512xi32>
    %c0_i32 = arith.constant 0 : i32
    %12 = vector.broadcast %c0_i32 : i32 to vector<1x512xi32>
    %13 = arith.cmpi sge, %11, %12 : vector<1x512xi32>
    %c256_i32_8 = arith.constant 256 : i32
    %14 = vector.broadcast %c256_i32_8 : i32 to vector<1x512xi32>
    %15 = arith.cmpi slt, %11, %14 : vector<1x512xi32>
    %16 = arith.andi %13, %15 : vector<1x512xi1>
    %cst = arith.constant 0.000000e+00 : f32
    %17 = vector.broadcast %cst : f32 to vector<4x512xf32>
    %18 = vector.shape_cast %16 : vector<1x512xi1> to vector<1x512xi1>
    %19 = vector.broadcast %18 : vector<1x512xi1> to vector<4x512xi1>
    %20 = arith.select %19, %6, %17 : vector<4x512xi1>, vector<4x512xf32>
    %cst_9 = arith.constant 5.000000e-01 : f32
    %21 = vector.broadcast %cst_9 : f32 to vector<4x512xf32>
    %22 = arith.mulf %21, %20 : vector<4x512xf32>
    %cst_10 = arith.constant 0.707106769 : f32
    %23 = vector.broadcast %cst_10 : f32 to vector<4x512xf32>
    %24 = arith.mulf %20, %23 : vector<4x512xf32>
    %25 = math.erf %24 : vector<4x512xf32>
    %cst_11 = arith.constant 1.000000e+00 : f32
    %26 = vector.broadcast %cst_11 : f32 to vector<4x512xf32>
    %27 = arith.addf %26, %25 : vector<4x512xf32>
    %28 = arith.mulf %22, %27 : vector<4x512xf32>
    %29 = vector.extract_strided_slice %28 {offsets = [0, 127], sizes = [4, 256], strides = [1, 1]} : vector<4x512xf32> to vector<4x256xf32>
    %30 = vector.extract_strided_slice %28 {offsets = [0, 128], sizes = [4, 256], strides = [1, 1]} : vector<4x512xf32> to vector<4x256xf32>
    %31 = vector.extract_strided_slice %28 {offsets = [0, 129], sizes = [4, 256], strides = [1, 1]} : vector<4x512xf32> to vector<4x256xf32>
    %32 = tpu.concatenate %29, %30, %31 in 0 : vector<4x256xf32>, vector<4x256xf32>, vector<4x256xf32> -> vector<12x256xf32>
    %c0_12 = arith.constant 0 : index
    %c0_13 = arith.constant 0 : index
    %33 = vector.load %arg5[%c0_12, %c0_13] : memref<8x12xf32, #tpu.memory_space<vmem>>, vector<8x12xf32>
    %cst_14 = arith.constant dense<0.000000e+00> : vector<8x256xf32>
    %34 = tpu.matmul %33, %32, %cst_14 {dimension_numbers = #tpu.dot_dimension_numbers<[1], [0], [0], [1], [0, 0, 1, 1], [], []>} : vector<8x12xf32>, vector<12x256xf32>, vector<8x256xf32> -> vector<8x256xf32>
    %c0_15 = arith.constant 0 : index
    %c0_16 = arith.constant 0 : index
    %35 = vector.load %arg6[%c0_15, %c0_16] : memref<8x1xf32, #tpu.memory_space<vmem>>, vector<8x1xf32>
    %36 = vector.broadcast %35 : vector<8x1xf32> to vector<8x256xf32>
    %37 = arith.addf %34, %36 : vector<8x256xf32>
    %c0_17 = arith.constant 0 : index
    %c0_18 = arith.constant 0 : index
    %c0_19 = arith.constant 0 : index
    %38 = vector.load %arg7[%c0_17, %c0_18, %c0_19] : memref<1x8x256xf32, #tpu.memory_space<vmem>>, vector<1x8x256xf32>
    %39 = vector.shape_cast %38 : vector<1x8x256xf32> to vector<8x256xf32>
    %40 = vector.shape_cast %37 : vector<8x256xf32> to vector<1x8x256xf32>
    tpu.vector_store %arg7[%c0_17, %c0_18, %c0_19], %40 {strides = array<i32>} : memref<1x8x256xf32, #tpu.memory_space<vmem>>, vector<1x8x256xf32>,
    return
  }
  func.func @transform_0(%arg0: i32, %arg1: i32) -> (i32, i32, i32) {
    %c0_i32 = arith.constant 0 : i32
    %0 = arith.minsi %arg1, %c0_i32 : i32
    %c0_i32_0 = arith.constant 0 : i32
    %c0_i32_1 = arith.constant 0 : i32
    return %arg0, %c0_i32_0, %0 : i32, i32, i32
  }
  func.func @transform_1(%arg0: i32, %arg1: i32) -> (i32, i32, i32) {
    %c2_i32 = arith.constant 2 : i32
    %0 = arith.muli %arg1, %c2_i32 : i32
    %c1_i32 = arith.constant 1 : i32
    %1 = arith.subi %0, %c1_i32 : i32
    %c0_i32 = arith.constant 0 : i32
    %c1_i32_0 = arith.constant 1 : i32
    %2 = arith.maxsi %c0_i32, %1 : i32
    %3 = arith.minsi %c1_i32_0, %2 : i32
    %c0_i32_1 = arith.constant 0 : i32
    %c0_i32_2 = arith.constant 0 : i32
    return %arg0, %c0_i32_1, %3 : i32, i32, i32
  }
  func.func @transform_2(%arg0: i32, %arg1: i32) -> (i32, i32, i32) {
    %c1_i32 = arith.constant 1 : i32
    %0 = arith.addi %arg1, %c1_i32 : i32
    %c2_i32 = arith.constant 2 : i32
    %1 = arith.muli %0, %c2_i32 : i32
    %c1_i32_0 = arith.constant 1 : i32
    %2 = arith.minsi %1, %c1_i32_0 : i32
    %c0_i32 = arith.constant 0 : i32
    %c0_i32_1 = arith.constant 0 : i32
    return %arg0, %c0_i32, %2 : i32, i32, i32
  }
  func.func @transform_3(%arg0: i32, %arg1: i32) -> (i32, i32) {
    %c0_i32 = arith.constant 0 : i32
    %c0_i32_0 = arith.constant 0 : i32
    %c0_i32_1 = arith.constant 0 : i32
    return %c0_i32, %c0_i32_0 : i32, i32
  }
  func.func @transform_4(%arg0: i32, %arg1: i32) -> (i32, i32) {
    %c0_i32 = arith.constant 0 : i32
    %c0_i32_0 = arith.constant 0 : i32
    %c0_i32_1 = arith.constant 0 : i32
    return %c0_i32, %c0_i32_0 : i32, i32
  }
  func.func @transform_5(%arg0: i32, %arg1: i32) -> (i32, i32, i32) {
    %c0_i32 = arith.constant 0 : i32
    %c0_i32_0 = arith.constant 0 : i32
    return %arg0, %c0_i32, %arg1 : i32, i32, i32
  }
}

</mosaic_0001>

<bundles_post_ra>
// kernel: tpu_custom_call.1
= control target key start
LH: loop header
LB: loop body
LE: loop exit
PB: predicated region body
PF: predicated region fallthrough
CT: control target
= control target key end

     0   :  { %s1398_s0 = inlined_call_operand.hbm [shape: f32[2,4,256], index: 0, kind: input, shape index: {}]   ;;  %s1399_s1 = inlined_call_operand.hbm [shape: f32[2,4,256], index: 1, kind: input, shape index: {}]   ;;  %s1400_s2 = inlined_call_operand.vmem [shape: f32[2,4,256], index: 2, kind: input, shape index: {}]   ;;  %s1401_s3 = inlined_call_operand.hbm [shape: f32[8,12], index: 3, kind: input, shape index: {}]   ;;  %s1402_s4 = inlined_call_operand.vmem [shape: f32[8,1], index: 4, kind: input, shape index: {}]   ;;  %s1403_s5 = inlined_call_operand.hbm [shape: f32[2,8,256], index: 5, kind: output, shape index: {}]  }
   0x1   :  { %1409 = sst [smem:[#allocation13_spill]] %s1398_s0 }
   0x2   :  { %1410 = sst [smem:[#allocation14_spill]] %s1401_s3 }
   0x3   :  { %10 = vsyncpa [#allocation3], 0 }
   0x4   :  { %12 = vsyncpa [#allocation3 + $0x1], 0 }
   0x5   :  { %13 = vsyncpa [#allocation6], 0 }
   0x6   :  { %15 = vsyncpa [#allocation6 + $0x1], 0 }
   0x7   :  { %16 = vsyncpa [#allocation4], 0 }
   0x8   :  { %18 = vsyncpa [#allocation4 + $0x1], 0  ;;  %s1129_s18 = smov 0   ;;  %s1131_s19 = smov 0  }
   0x9   :  { %s1133_s2 = smov 0   ;;  %s1135_s20 = smov 0  }
   0xa   :  { %s1137_s21 = smov 0   ;;  %s1139_s22 = smov 0  }
   0xb LB: > { %s1160_s23 = sadd.s32 4294967295, %s1087_s22   ;;  %s758_s24 = sadd.s32 4294967294, %s1087_s22   ;;  %s1087_s22 = sphi %s1139_s22, %s24_s22   ;;  %s1083_s21 = sphi %s1137_s21, %s1436_s21   ;;  %s1079_s20 = sphi %s1135_s20, %s1435_s20   ;;  %s1075_s2 = sphi %s1133_s2, %s1434_s2   ;;  %s1071_s19 = sphi %s1131_s19, %s1433_s19   ;;  %s1067_s18 = sphi %s1129_s18, %s1432_s18  }
   0xc   : > { %p1405_p0 = scmp.ne.s32.totalorder %s1075_s2, %s1071_s19  ;;  %p62_p1 = scmp.ne.s32.totalorder %s1071_s19, %s1067_s18 }
   0xd   : > { %p1404_p2 = scmp.eq.s32.totalorder %s1160_s23, 0  ;;  %p206_p3 = scmp.eq.s32.totalorder %s1160_s23, 1 }
   0xe   : > { %p212_p4 = scmp.eq.s32.totalorder %s758_s24, 1  ;;  %p759_p5 = scmp.ge.s32.totalorder %s1087_s22, 1 }
   0xf   : > { %p1172_p6 = por %p1404_p2, %p62_p1  ;;  %p1179_p7 = por %p206_p3, %p1405_p0 }
  0x10   : > { %p1183_p8 = por %p212_p4, %p62_p1  ;;  %p219_p9 = scmp.lt.s32.totalorder %s1087_s22, 3 }
  0x11   : > { %s1411_s25 = scalar_select %p1172_p6, 1, 0 }
  0x12   : > { %s1412_s26 = scalar_select %p1179_p7, 1, 0 }
  0x13   : > { %s1413_s27 = scalar_select %p1183_p8, 1, 0 }
  0x14   : > { %p1188_p10 = pnand %p759_p5, %p219_p9  ;;  %s1089_s29 = smov [#allocation7]  }
  0x15   : > { %s232_s30 = sshll.u32 %s1089_s29, 4  ;;  %s49_s6 = sadd.s32 1, %s1075_s2  ;;  %s233_s30 = int_to_ptr.vmem [resolvable:$true] %s232_s30 }
  0x16   : > { %s1414_s28 = scalar_select %p1188_p10, 1, 0 }
  0x17   : > { %p804_p12 = pneg %p1188_p10  ;;  %s36_s8 = sadd.s32 1, %s1083_s21 }
  0x18   : > { %p1203_p1 = scmp.ge.s32.totalorder %s36_s8, 2  ;;  %s1417_s3 = sld [smem:[#allocation14_spill]] }
  0x19   : > { %p1198_p13 = pnand %p804_p12, %p1404_p2 }
  0x1a   : > { %s1416_s9 = scalar_select %p1203_p1, 1, 0 }
  0x1b   : > { %p911_p9 = pneg %p1198_p13 }
  0x1e   : > { %s909_s12 = scalar_lea.hbm %s1417_s3, 128 }
  0x1f   : > { %p910_p5 = scmp.ne.s32.totalorder %s1417_s3, %s909_s12  ;;  %p916_p2 = scmp.lt.u32.totalorder %s909_s12, %s1417_s3 }
  0x21   : > { %p912_p12 = pnand %p911_p9, %p910_p5 }
  0x23   : > { %p913_p11 = pneg %p912_p12 }
  0x25   : > { %p918_p0 = pnand %p916_p2, %p913_p11 }
  0x27   : > { %921 = shalt.err (!%p918_p0)
}
  0x28   : > { %s922_s17 = scalar_lea.vmem %s233_s30, 128  ;;  %p930_p7 = scmp.lt.s32.totalorder %s233_s30, %s233_s30 }
  0x29   : > { %p923_p4 = scmp.ne.s32.totalorder %s233_s30, %s922_s17  ;;  %p931_p6 = scmp.lt.s32.totalorder %s922_s17, %s922_s17 }
  0x2b   : > { %p925_p3 = pnand %p923_p4, %p911_p9  ;;  %p932_p10 = por %p931_p6, %p930_p7 }
  0x2d   : > { %p926_p8 = pneg %p925_p3 }
  0x2f   : > { %p933_p1 = pnand %p932_p10, %p926_p8 }
  0x31   : > { %936 = shalt.err (!%p933_p1)
}
  0x32   : > { %807 = dma.hbm_to_vmem [thread:$0]  (!%p1198_p13), %s1417_s3, 128, %s233_s30, [#allocation6]  }
  0x33   : > { %p1418_p0 = scmp.ne.s32.totalorder %s1416_s9, 0  ;;  %p1419_p2 = scmp.ne.s32.totalorder %s1075_s2, %s1071_s19 }
  0x34   : > { %p1420_p6 = scmp.eq.s32.totalorder %s1087_s22, 0  ;;  %s1235_s7 = sand.u32 1, %s1075_s2  }
  0x35   : > { %s1438_s8 = smov (%p1418_p0, %s36_s8), 0  ;;  %s762_s11 = sshll.u32 %s1235_s7, 3 }
  0x36   : > { %p58_p7 = por %p1420_p6, %p1419_p2  ;;  %s44_s10 = ssub.s32 %s1083_s21, %s1438_s8 }
  0x37   : > { %p47_p8 = scmp.eq.s32.totalorder %s44_s10, 0  ;;  %s783_s12 = sshll.u32 %s1083_s21, 7 }
  0x38   : > { %s1421_s0 = sld [smem:[#allocation13_spill]]  ;;  %s250_s15 = scalar_lea.vmem [#allocation2], %s762_s11 }
  0x39   : > { %s1244_s13 = scalar_select %p47_p8, %s1075_s2, %s49_s6  }
  0x3a   : > { %s262_s16 = sshll.u32 %s250_s15, 4  ;;  %p1422_p10 = scmp.lt.s32.totalorder %s1087_s22, 2  ;;  %s1253_s16 = int_to_ptr.vmem [resolvable:$true] %s262_s16 }
  0x3b   : > { %s247_s24 = scalar_lea.sflag [#allocation3], %s1235_s7 }
  0x3c   : > { %p1257_p11 = pnand %p1422_p10, %p58_p7 }
  0x3e   : > { %s1251_s14 = scalar_lea.hbm %s1421_s0, %s783_s12  ;;  %p939_p1 = pneg %p1257_p11 }
  0x3f   : > { %s937_s29 = scalar_lea.hbm %s1251_s14, 128  ;;  %s942_s30 = scalar_lea.hbm %s1421_s0, 256 }
  0x40   : > { %p938_p13 = scmp.ne.s32.totalorder %s1251_s14, %s937_s29  ;;  %p943_p5 = scmp.lt.u32.totalorder %s1251_s14, %s1421_s0 }
  0x41   : > { %p944_p9 = scmp.lt.u32.totalorder %s942_s30, %s937_s29  ;;  %p946_p0 = scmp.lt.u32.totalorder %s937_s29, %s1251_s14 }
  0x42   : > { %p940_p3 = pnand %p939_p1, %p938_p13 }
  0x43   : > { %p945_p12 = por %p944_p9, %p943_p5 }
  0x44   : > { %p941_p4 = pneg %p940_p3 }
  0x45   : > { %p947_p2 = por %p946_p0, %p945_p12 }
  0x47   : > { %p948_p6 = pnand %p947_p2, %p941_p4 }
  0x49   : > { %951 = shalt.err (!%p948_p6)
}
  0x4a   : > { %s952_s6 = scalar_lea.vmem %s1253_s16, 128  ;;  %s1090_s10 = smov [#allocation2]  }
  0x4b   : > { %p953_p7 = scmp.ne.s32.totalorder %s1253_s16, %s952_s6  ;;  %s957_s11 = sshll.u32 %s1090_s10, 4  ;;  %s958_s11 = int_to_ptr.vmem [resolvable:$false] %s957_s11 }
  0x4c   : > { %s959_s9 = scalar_lea.vmem %s958_s11, 256  ;;  %p960_p13 = scmp.lt.s32.totalorder %s1253_s16, %s958_s11 }
  0x4d   : > { %p955_p8 = pnand %p953_p7, %p939_p1  ;;  %p961_p3 = scmp.lt.s32.totalorder %s959_s9, %s952_s6 }
  0x4f   : > { %p956_p10 = pneg %p955_p8  ;;  %p962_p5 = por %p961_p3, %p960_p13 }
  0x51   : > { %p963_p9 = pnand %p962_p5, %p956_p10 }
  0x53   : > { %966 = shalt.err (!%p963_p9)
}
  0x54   : > { %811 = dma.hbm_to_vmem [thread:$0]  (!%p1257_p11), %s1251_s14, 128, %s1253_s16, %s247_s24  }
  0x55   : > { %s1293_s15 = scalar_lea.hbm %s1399_s1, %s783_s12  ;;  %s765_s6 = sshll.u32 %s1235_s7, 2 }
  0x56   : > { %s273_s10 = scalar_lea.vmem [#allocation5], %s765_s6  ;;  %s1424_s9 = sand.u32 1, %s1087_s22  }
  0x57   : > { %s288_s11 = sshll.u32 %s273_s10, 4  ;;  %s270_s0 = scalar_lea.sflag [#allocation6], %s1424_s9  ;;  %s289_s11 = int_to_ptr.vmem [resolvable:$true] %s288_s11 }
  0x58   : > { %s967_s3 = scalar_lea.hbm %s1293_s15, 64  ;;  %s972_s12 = scalar_lea.hbm %s1399_s1, 256 }
  0x59   : > { %p968_p4 = scmp.ne.s32.totalorder %s1293_s15, %s967_s3  ;;  %p973_p2 = scmp.lt.u32.totalorder %s1293_s15, %s1399_s1 }
  0x5a   : > { %p974_p6 = scmp.lt.u32.totalorder %s972_s12, %s967_s3  ;;  %p976_p8 = scmp.lt.u32.totalorder %s967_s3, %s1293_s15 }
  0x5b   : > { %p970_p12 = pnand %p968_p4, %p939_p1 }
  0x5c   : > { %p975_p7 = por %p974_p6, %p973_p2 }
  0x5d   : > { %p971_p0 = pneg %p970_p12 }
  0x5e   : > { %p977_p10 = por %p976_p8, %p975_p7 }
  0x60   : > { %p978_p13 = pnand %p977_p10, %p971_p0 }
  0x62   : > { %981 = shalt.err (!%p978_p13)
}
  0x63   : > { %s982_s7 = scalar_lea.vmem %s289_s11, 64  ;;  %s1091_s30 = smov [#allocation5]  }
  0x64   : > { %p983_p3 = scmp.ne.s32.totalorder %s289_s11, %s982_s7  ;;  %s987_s6 = sshll.u32 %s1091_s30, 4  ;;  %s988_s6 = int_to_ptr.vmem [resolvable:$false] %s987_s6 }
  0x65   : > { %s989_s10 = scalar_lea.vmem %s988_s6, 128  ;;  %p990_p4 = scmp.lt.s32.totalorder %s289_s11, %s988_s6 }
  0x66   : > { %p985_p5 = pnand %p983_p3, %p939_p1  ;;  %p991_p12 = scmp.lt.s32.totalorder %s989_s10, %s982_s7 }
  0x68   : > { %p986_p9 = pneg %p985_p5  ;;  %p992_p2 = por %p991_p12, %p990_p4 }
  0x6a   : > { %p993_p6 = pnand %p992_p2, %p986_p9 }
  0x6c   : > { %996 = shalt.err (!%p993_p6)
}
  0x6d   : > { %814 = dma.hbm_to_vmem [thread:$0]  (!%p1257_p11), %s1293_s15, 64, %s289_s11, %s270_s0  }
  0x6e   : > { %p1425_p0 = scmp.ne.s32.totalorder %s1414_s28, 0 }
  0x6f   : > { %s1320_s3 = sand.u32 (!%p1425_p0), 1, %s1071_s19   ;;  %p1426_p1 = scmp.ne.s32.totalorder (!%p1425_p0), %s1411_s25, 0 }
  0x70   : > { %316 = sbr.rel (%p1425_p0) target bundleno = 627 (0x273), region = 40  ;;  %s769_s9 = sshll.u32 (!%p1425_p0), %s1320_s3, 3 }
  0x71   : > { %s319_s14 = scalar_lea.sflag (!%p1425_p0), [#allocation3], %s1320_s3  ;;  %s322_s16 = scalar_lea.vmem (!%p1425_p0), [#allocation2], %s769_s9 }
  0x77   : > { %1050 = dma.done.wait (%p1426_p1), %s319_s14, 128  }
  0x78   : > { %1052 = vsyncadd (%p1426_p1), %s319_s14, 4294967168  ;;  %s327_s0 = sand.u32 1, %s1160_s23  }
  0x79   : > { %s328_s17 = scalar_lea.sflag [#allocation6], %s327_s0 }
  0x7a   : > { %1054 = dma.done.wait (%p1426_p1), %s328_s17, 64  }
  0x7b   : > { %1056 = vsyncadd (%p1426_p1), %s328_s17, 4294967232  ;;  %p1427_p11 = scmp.eq.s32.totalorder %s1160_s23, 0 }
  0x7d   : > { %1058 = dma.done.wait (%p1427_p11), [#allocation6], 128   ;;  %p1428_p7 = pmov %p1427_p11 }
  0x7e   : > { %v1092_v0 = vmov 0.0   ;;  %s1093_s28 = smov 126   ;;  %v406_v1 = vld [vmem:[%s322_s16] sm:$0xff]  ;;  %s1094_s23 = smov 127   ;;  %vm475_vm0 = vcmask 1039360   ;;  %vm490_vm1 = vcmask 1043456  }
  0x7f   : > { %1060 = vsyncadd (%p1428_p7), [#allocation6], 4294967168  ;;  %485 = vrot.lane.b32.xlu1 %v1092_v0, %s1093_s28  ;;  %595 = vmatprep.mubr.f32.mxu0 %v1092_v0  ;;  %v409_v2 = vcombine.high %v406_v1, %v406_v1  ;;  %v452_v3 = vmul.f32 0.70710677, %v406_v1  ;;  %v448_v5 = vmul.f32 0.5, %v406_v1  ;;  %vm487_vm2 = vcmask 1031168  }
  0x80   : > { %s1095_s25 = smov 1   ;;  %v1096_v30 = vmov 0   ;;  %v495_v34 = vld [vmem:[%s1402_s4] sm:$0xff]  ;;  %vm516_vm3 = vcmask 7168   ;;  %vm1097_vm4 = vmmov 1   ;;  %v494_v50 = vld [vmem:[#allocation7] sm:$0xff] }
  0x81   : > { %v453_v4 = vmul.f32 0.70710677, %v409_v2  ;;  %905 = verf.f32 %v452_v3  ;;  %v449_v7 = vmul.f32 0.5, %v409_v2  ;;  %903 = vset.pattern.permute.xlu0 %v1096_v30  ;;  %vm789_vm5 = vmpackc.low %vm490_vm1, %vm1097_vm4  ;;  %vm523_vm6 = vcmask 97280   ;;  %s772_s12 = sshll.u32 %s1320_s3, 4  ;;  %s787_s24 = sshll.u32 %s1079_s20, 8 }
  0x82   : > { %s378_s29 = scalar_lea.vmem [#allocation8], %s772_s12  ;;  %s1349_s10 = scalar_lea.hbm %s1403_s5, %s787_s24 }
  0x83   : > { %907 = verf.f32 %v453_v4  ;;  %s621_s7 = sshll.u32 %s378_s29, 4  ;;  %s605_s9 = scalar_lea.sflag [#allocation4], %s1320_s3  ;;  %s1351_s7 = int_to_ptr.vmem [resolvable:$true] %s621_s7 }
  0x84   : > { %s997_s20 = scalar_lea.vmem %s1351_s7, 256  ;;  %p1429_p10 = scmp.ne.s32.totalorder %s1412_s26, 0 }
  0x85   : > { %p998_p8 = scmp.ne.s32.totalorder %s1351_s7, %s997_s20  ;;  %s1098_s14 = smov [#allocation8]  }
  0x86   : > { %s1001_s16 = sshll.u32 %s1098_s14, 4  ;;  %s1002_s16 = int_to_ptr.vmem [resolvable:$false] %s1001_s16 }
  0x87   : > { %p999_p13 = pnand %p998_p8, %p1429_p10  ;;  %s1003_s0 = scalar_lea.vmem %s1002_s16, 512 }
  0x88   : > { %p1004_p5 = scmp.lt.s32.totalorder %s1351_s7, %s1002_s16  ;;  %p1005_p9 = scmp.lt.s32.totalorder %s1003_s0, %s997_s20 }
  0x89   : > { %p1000_p3 = pneg %p999_p13 }
  0x8a   : > { %p1006_p4 = por %p1005_p9, %p1004_p5 }
  0x8b   : > { %v906_v6 = vpop.eup %905 }
  0x8c   : > { %v460_v8 = vadd.f32 1.0, %v906_v6  ;;  %p1007_p12 = pnand %p1006_p4, %p1000_p3 }
  0x8d   : > { %v908_v9 = vpop.eup %907 }
  0x8e   : > { %v461_v10 = vadd.f32 1.0, %v908_v9  ;;  %v464_v11 = vmul.f32 %v460_v8, %v448_v5 }
  0x90   : > { %v465_v12 = vmul.f32 %v461_v10, %v449_v7  ;;  %v469_v13 = vrot.slane %v464_v11, 4 }
  0x92   : > { %v470_v14 = vrot.slane %v465_v12, 4  ;;  %v883_v16 = vpack.i.bf16 %v465_v12, %v464_v11 }
  0x94   : > { %v878_v15 = vpack.i.bf16 %v470_v14, %v469_v13 }
  0x96   : > { %879 = vrot.lane.b32.xlu0 %v878_v15, %s1094_s23 }
  0x9a   : > { %884 = vrot.lane.b32.xlu0 %v883_v16, %s1093_s28 }
  0xf1   : > { %v486_v23 = vpop.permute.xlu1 %485 }
 0x108   : > { %v880_v17 = vpop.permute.xlu0 %879 }
 0x109   : > { %v882_v18 = vunpack.i.h.bf16 %v880_v17  ;;  %v881_v19 = vunpack.i.l.bf16 %v880_v17 }
 0x10b   : > { %v476_v20 = vsel %vm475_vm0, %v881_v19, %v882_v18  ;;  %v493_v21 = vsel %vm490_vm1, %v465_v12, %v882_v18  ;;  %v491_v31 = vsel %vm490_vm1, 0.0, %v881_v19 }
 0x10c   : > { %v885_v22 = vpop.permute.xlu0 %884  ;;  %v492_v24 = vsel %vm490_vm1, %v464_v11, %v476_v20 }
 0x10d   : > { %v887_v25 = vunpack.i.h.bf16 %v885_v22  ;;  %v886_v26 = vunpack.i.l.bf16 %v885_v22  ;;  %v893_v27 = vpack.i.bf16 %v493_v21, %v492_v24 }
 0x10f   : > { %v488_v28 = vsel %vm487_vm2, %v886_v26, %v887_v25  ;;  %v489_v29 = vsel %vm487_vm2, %v887_v25, %v486_v23  ;;  %894 = vrot.lane.b32.xlu1 %v893_v27, %s1095_s25  ;;  %v898_v33 = vpack.i.bf16 %v886_v26, %v491_v31 }
 0x110   : > { %v888_v32 = vpack.i.bf16 %v489_v29, %v488_v28 }
 0x112   : > { %889 = vrot.lane.b32.xlu0 %v888_v32, %s1095_s25 }
 0x113   : > { %899 = vrot.lane.b32.xlu1 %v898_v33, %s1095_s25 }
 0x116   : > { %498 = vperm.xlu0 %903, %v495_v34  }
 0x181   : > { %v895_v35 = vpop.permute.xlu1 %894 }
 0x182   : > { %v897_v36 = vunpack.i.h.bf16 %v895_v35  ;;  %v896_v37 = vunpack.i.l.bf16 %v895_v35 }
 0x184   : > { %v890_v38 = vpop.permute.xlu0 %889  ;;  %v518_v44 = vsel %vm516_vm3, %v896_v37, %v897_v36 }
 0x185   : > { %v892_v39 = vunpack.i.h.bf16 %v890_v38  ;;  %v891_v40 = vunpack.i.l.bf16 %v890_v38  ;;  %v900_v41 = vpop.permute.xlu1 %899 }
 0x186   : > { %v902_v42 = vunpack.i.h.bf16 %v900_v41  ;;  %v901_v43 = vunpack.i.l.bf16 %v900_v41 }
 0x187   : > { %v520_v45 = vsel %vm516_vm3, %v891_v40, %v892_v39 }
 0x188   : > { %v788_v46 = vpack.c.bf16 %v520_v45, %v518_v44  ;;  %v517_v47 = vsel %vm516_vm3, %v901_v43, %v896_v37  ;;  %v519_v48 = vsel %vm516_vm3, %v902_v42, %v891_v40 }
 0x189   : > { %v791_v49 = vpack.c.bf16 %v519_v48, %v517_v47 }
 0x18a   : > { %790 = vmatprep.subr.msk.bf16.mxu0 %vm789_vm5, %v788_v46 }
 0x18b   : > { %793 = vmatpush1.bf16.msk.msra.mxu0 %vm789_vm5, %v791_v49 }
 0x18e   : > { %777 = vmatmul.mubr.msk.f32.vlgmr.msra.gmra.mrb[0].mxu0 %vm523_vm6, %v494_v50 }
 0x195   : > { %v499_v51 = vpop.permute.xlu0 %498 }
 0x261   : > { %v597_v52 = vpop.f32.mrb[0].mxu0 }
 0x262   : > { %v598_v53 = vadd.f32 %v597_v52, %v499_v51  ;;  %v599_v54 = vpop.f32.mrb[1].mxu0 }
 0x263   : > { %v600_v55 = vadd.f32 %v599_v54, %v499_v51 }
 0x264   : > { %602 = vst [vmem:[%s378_s29] sm:$0xff] %v598_v53 }
 0x265   : > { %603 = vst [vmem:[%s378_s29 + $0x8] sm:$0xff] %v600_v55 }
 0x266   : > { %1010 = shalt.err (!%p1007_p12)
}
 0x267   : > { %s1011_s3 = scalar_lea.hbm %s1349_s10, 256  ;;  %s1015_s23 = scalar_lea.hbm %s1403_s5, 512 }
 0x268   : > { %p1012_p2 = scmp.ne.s32.totalorder %s1349_s10, %s1011_s3  ;;  %p1016_p1 = scmp.lt.u32.totalorder %s1349_s10, %s1403_s5 }
 0x269   : > { %p1017_p11 = scmp.lt.u32.totalorder %s1015_s23, %s1011_s3  ;;  %p1019_p8 = scmp.lt.u32.totalorder %s1011_s3, %s1349_s10 }
 0x26a   : > { %p1013_p6 = pnand %p1012_p2, %p1429_p10 }
 0x26b   : > { %p1018_p7 = por %p1017_p11, %p1016_p1 }
 0x26c   : > { %p1014_p0 = pneg %p1013_p6 }
 0x26d   : > { %p1020_p13 = por %p1019_p8, %p1018_p7 }
 0x26f   : > { %p1021_p3 = pnand %p1020_p13, %p1014_p0 }
 0x271   : > { %1024 = shalt.err (!%p1021_p3)
}
 0x272   : > { %802 = dma.vmem_to_hbm [thread:$0]  (%p1429_p10), %s1351_s7, 256, %s1349_s10, %s605_s9  }
 0x273 PF: > { %s633_s11 = sand.u32 1, %s1067_s18   ;;  %p1430_p5 = scmp.ne.s32.totalorder %s1413_s27, 0 }
 0x274   : > { %p1431_p9 = scmp.ge.s32.totalorder %s1087_s22, 2  ;;  %s634_s12 = scalar_lea.sflag [#allocation4], %s633_s11 }
 0x276   : > { %p816_p4 = pnand %p1431_p9, %p1430_p5 }
 0x278   : > { %1062 = dma.done.wait (!%p816_p4), %s634_s12, 256  }
 0x279   : > { %1064 = vsyncadd (!%p816_p4), %s634_s12, 4294967040  ;;  %s24_s22 = sadd.s32 1, %s1087_s22   ;;  %s1432_s18 = smov %s1071_s19 }
 0x27a   : > { %p21_p12 = scmp.ge.s32.totalorder %s24_s22, 4   ;;  %s1433_s19 = smov %s1075_s2 }
 0x27b   : > { %s1434_s2 = smov %s1244_s13  ;;  %s1435_s20 = smov %s1083_s21 }
 0x27c   : > { %s1436_s21 = smov %s1438_s8  ;;  %23 = sbr.rel (!%p21_p12) target bundleno = 11 (0xb), region = 105 }
 0x283   :  { %639 = vsyncpa [#allocation3], 1 }
 0x284   :  { %641 = vsyncpa [#allocation3 + $0x1], 1 }
 0x285   :  { %642 = vsyncpa [#allocation6], 1 }
 0x286   :  { %644 = vsyncpa [#allocation6 + $0x1], 1 }
 0x287   :  { %645 = vsyncpa [#allocation4], 1 }
 0x288   :  { %647 = vsyncpa [#allocation4 + $0x1], 1 }

</bundles_post_ra>
